<compile_context>
chip_gen: v5e
topology: v5e:2x2
jax: 0.10.0
libtpu: 0.0.40
codegen_flags: <defaults>
</compile_context>

<pallas_src>
import jax
import jax.numpy as jnp
from jax import lax
from jax.experimental import pallas as pl
from jax.experimental.pallas import tpu as pltpu

SUBLANE = 8


def _ru(n, m):
    return ((n + m - 1) // m) * m


def _pad_rows(x, rows):
    return jnp.pad(x, ((0, rows - x.shape[0]), (0, 0)))


# ---------------------------------------------------------------------------
# Per-layer kernel: sparse 'add' aggregation + GraphConv; optionally fused
# with the 3-layer MLP classifier + log_softmax (last layer only).
# Kernel args: (src, dst, tile_start)  <- scalar prefetch (SMEM)
#              x, w_rel, b_rel, w_root [, w1,b1,w2,b2,w3,b3], out, acc_scratch
# ---------------------------------------------------------------------------
def make_graphconv_kernel(dst_tile, fuse_classifier):
    def kernel(src_ref, dst_ref, tstart_ref, x_ref, w_rel_ref, b_rel_ref,
               w_root_ref, *rest):
        if fuse_classifier:
            (w1_ref, b1_ref, w2_ref, b2_ref, w3_ref, b3_ref,
             out_ref, acc_ref) = rest
        else:
            out_ref, acc_ref = rest

        t = pl.program_id(0)
        row_base = pl.multiple_of(t * dst_tile, dst_tile)

        # ---- sparse segment-sum over this dst tile's (dst-sorted) edges ----
        acc_ref[...] = jnp.zeros_like(acc_ref)
        e_lo = tstart_ref[t]
        e_hi = tstart_ref[t + 1]

        def edge_body(e, carry):
            s = src_ref[e]                      # global source row
            d = dst_ref[e] - row_base           # local dst row within tile
            row = x_ref[pl.ds(s, 1), :]         # (1, C) gather of source feats
            acc_ref[pl.ds(d, 1), :] = acc_ref[pl.ds(d, 1), :] + row
            return carry

        lax.fori_loop(e_lo, e_hi, edge_body, 0)
        # TODO(synk): vectorize the per-edge gather/segment-sum (chunked
        # sorted-run accumulation or DMA gather) for very high-degree graphs.

        # ---- GraphConv: relu(agg @ W_rel + b_rel + x_tgt @ W_root) ----
        x_tgt = x_ref[pl.ds(row_base, dst_tile), :]
        h = (jnp.dot(acc_ref[...].astype(jnp.bfloat16), w_rel_ref[...],
                     preferred_element_type=jnp.float32)
             + jnp.dot(x_tgt.astype(jnp.bfloat16), w_root_ref[...],
                       preferred_element_type=jnp.float32)
             + b_rel_ref[...])
        h = jnp.maximum(h, 0.0)
        # TODO(synk): training-mode dropout (pltpu.prng_*) omitted; eval-mode
        # identity only.

        if not fuse_classifier:
            out_ref[...] = h.astype(out_ref.dtype)
            return

        # ---- fused classifier MLP + log_softmax (last layer only) ----
        h = jnp.maximum(jnp.dot(h.astype(jnp.bfloat16), w1_ref[...],
                                preferred_element_type=jnp.float32)
                        + b1_ref[...], 0.0)
        h = jnp.maximum(jnp.dot(h.astype(jnp.bfloat16), w2_ref[...],
                                preferred_element_type=jnp.float32)
                        + b2_ref[...], 0.0)
        logits = (jnp.dot(h.astype(jnp.bfloat16), w3_ref[...],
                          preferred_element_type=jnp.float32) + b3_ref[...])
        z = logits - jnp.max(logits, axis=-1, keepdims=True)
        out_ref[...] = (z - jnp.log(jnp.sum(jnp.exp(z), axis=-1,
                                            keepdims=True))).astype(out_ref.dtype)

    return kernel


# ---------------------------------------------------------------------------
# One GraphConv layer (optionally with the classifier tail fused).
# ---------------------------------------------------------------------------
def graphconv_layer(x, edge_index, n_dst, layer_params, classifier=None,
                    dst_tile=128):
    n_src, c_in = x.shape
    hidden = layer_params["w_rel"].shape[1]
    fuse = classifier is not None

    # dst-node tiling (sublane aligned)
    tm = _ru(min(dst_tile, _ru(n_dst, SUBLANE)), SUBLANE)
    n_dst_pad = _ru(n_dst, tm)
    num_tiles = n_dst_pad // tm
    n_src_pad = max(_ru(n_src, SUBLANE), n_dst_pad)

    # features stay f32 in VMEM (robust dynamic row gather); matmul operands
    # are cast to bf16 inside the kernel.
    x_p = _pad_rows(x.astype(jnp.float32), n_src_pad)

    # dst-sorted edges + per-dst-tile edge offsets -> scalar-prefetch metadata
    src = edge_index[0].astype(jnp.int32)
    dst = edge_index[1].astype(jnp.int32)
    order = jnp.argsort(dst)
    src_s = src[order]
    dst_s = dst[order]
    tstart = jnp.searchsorted(
        dst_s, jnp.arange(num_tiles + 1, dtype=jnp.int32) * tm).astype(jnp.int32)

    w_rel = layer_params["w_rel"].astype(jnp.bfloat16)
    b_rel = layer_params["b_rel"].astype(jnp.float32)
    w_root = layer_params["w_root"].astype(jnp.bfloat16)

    def const_map(t, *_):
        return (0, 0)

    in_specs = [
        pl.BlockSpec((n_src_pad, c_in), const_map),   # x        (resident)
        pl.BlockSpec((c_in, hidden), const_map),      # w_rel    (resident)
        pl.BlockSpec((1, hidden), const_map),         # b_rel    (resident)
        pl.BlockSpec((c_in, hidden), const_map),      # w_root   (resident)
    ]
    operands = [x_p, w_rel, b_rel, w_root]

    if fuse:
        (w1, b1), (w2, b2), (w3, b3) = classifier
        c_out = w3.shape[1]
        cls_ops = [w1.astype(jnp.bfloat16), b1.astype(jnp.float32),
                   w2.astype(jnp.bfloat16), b2.astype(jnp.float32),
                   w3.astype(jnp.bfloat16), b3.astype(jnp.float32)]
        for a in cls_ops:
            in_specs.append(pl.BlockSpec(a.shape, const_map))
        operands += cls_ops
        out_dim = c_out
    else:
        out_dim = hidden

    out_spec = pl.BlockSpec((tm, out_dim), lambda t, *_: (t, 0))

    grid_spec = pltpu.PrefetchScalarGridSpec(
        num_scalar_prefetch=3,
        grid=(num_tiles,),
        in_specs=in_specs,
        out_specs=out_spec,
        scratch_shapes=[pltpu.VMEM((tm, c_in), jnp.float32)],  # f32 accumulator
    )

    # advisory cost estimate (sparse agg + 2 GraphConv matmuls [+ classifier])
    e_cnt = int(src.shape[0])
    flops = 2 * e_cnt * c_in + 4 * n_dst_pad * c_in * hidden
    transcendentals = 0
    if fuse:
        flops += 2 * n_dst_pad * (2 * hidden * hidden + hidden * out_dim)
        transcendentals = n_dst_pad * out_dim
    in_bytes = sum(int(a.size) * a.dtype.itemsize for a in operands)
    bytes_accessed = in_bytes + 4 * (2 * e_cnt + num_tiles + 1) \
        + 4 * n_dst_pad * out_dim
    cost = pl.CostEstimate(flops=flops, transcendentals=transcendentals,
                           bytes_accessed=bytes_accessed)

    # VMEM budget: 2 buffers per streamed/resident block + out tiles + scratch
    block_bytes = 2 * in_bytes + 2 * tm * out_dim * 4 + tm * c_in * 4
    vmem_limit = int(min(100 * 2**20, max(4 * 2**20, 2 * block_bytes)))

    out = pl.pallas_call(
        make_graphconv_kernel(tm, fuse),
        out_shape=jax.ShapeDtypeStruct((n_dst_pad, out_dim), jnp.float32),
        grid_spec=grid_spec,
        compiler_params=pltpu.CompilerParams(
            dimension_semantics=("parallel",),     # dst-tile axis: megacore on v7x
            vmem_limit_bytes=vmem_limit,
        ),
        cost_estimate=cost,
    )(src_s, dst_s, tstart, *operands)
    return out


# ---------------------------------------------------------------------------
# Parameter init (PyTorch-Linear-like); weights stored [in, out], bias [1, out]
# ---------------------------------------------------------------------------
def init_linear(key, fan_in, fan_out, bias=True):
    kw, kb = jax.random.split(key)
    bound = 1.0 / jnp.sqrt(jnp.float32(fan_in))
    w = jax.random.uniform(kw, (fan_in, fan_out), jnp.float32, -bound, bound)
    b = jax.random.uniform(kb, (1, fan_out), jnp.float32, -bound, bound) if bias else None
    return w, b


def init_gnn_params(key, in_channels, hidden, out_channels, num_embedding_layers):
    keys = jax.random.split(key, 2 * num_embedding_layers + 3)
    embedding = []
    cin = in_channels
    for layer in range(num_embedding_layers):
        w_rel, b_rel = init_linear(keys[2 * layer], cin, hidden, bias=True)
        w_root, _ = init_linear(keys[2 * layer + 1], cin, hidden, bias=False)
        embedding.append({"w_rel": w_rel, "b_rel": b_rel, "w_root": w_root})
        cin = hidden
    c1 = init_linear(keys[-3], hidden, hidden)
    c2 = init_linear(keys[-2], hidden, hidden)
    c3 = init_linear(keys[-1], hidden, out_channels)
    return {"embedding": embedding, "classifier": [c1, c2, c3]}


def gnn_forward(params, x_all, n_id, adjs, dst_tile=128):
    """adjs: list of (edge_index [2,E] int32, n_dst int) per sampled layer.
    Dropout is identity (eval mode)."""
    emb = params["embedding"]
    cls = params["classifier"]
    num_layers = len(emb)
    assert num_layers >= 1 and len(adjs) == num_layers

    # TODO(synk): fuse this row gather into layer 0 via a scalar-prefetch DMA
    # gather (x_all kept in HBM with memory_space=pl.ANY); done by XLA here.
    x = x_all[n_id].astype(jnp.float32)

    for layer, (edge_index, n_dst) in enumerate(adjs):
        is_last = layer == num_layers - 1
        x = graphconv_layer(x, edge_index, int(n_dst), emb[layer],
                            classifier=(cls if is_last else None),
                            dst_tile=dst_tile)
    n_final = int(adjs[-1][1])
    return x[:n_final]          # drop padded dst rows; class dim is unpadded


def gnn_reference(params, x_all, n_id, adjs):
    """Pure-JAX f32 reference (same math, scatter-add aggregation)."""
    x = x_all[n_id]
    for (edge_index, n_dst), p in zip(adjs, params["embedding"]):
        src, dst = edge_index[0], edge_index[1]
        x_tgt = x[:n_dst]
        agg = jnp.zeros((n_dst, x.shape[1]), jnp.float32).at[dst].add(x[src])
        x = jnp.maximum(agg @ p["w_rel"] + p["b_rel"] + x_tgt @ p["w_root"], 0.0)
    (w1, b1), (w2, b2), (w3, b3) = params["classifier"]
    x = jnp.maximum(x @ w1 + b1, 0.0)
    x = jnp.maximum(x @ w2 + b2, 0.0)
    x = x @ w3 + b3
    return jax.nn.log_softmax(x, axis=-1)


if __name__ == "__main__":
    key = jax.random.PRNGKey(0)
    k_param, k_x, k_nid, k_e0s, k_e0d, k_e1s, k_e1d = jax.random.split(key, 7)

    # small deterministic problem
    N_ALL, C_IN, HIDDEN, C_OUT = 64, 16, 32, 8
    NUM_LAYERS = 2
    N0, N1, N2 = 16, 12, 8        # sampled-node counts per hop
    E0, E1 = 48, 32               # edges per sampled bipartite layer

    params = init_gnn_params(k_param, C_IN, HIDDEN, C_OUT, NUM_LAYERS)

    x_all = jax.random.normal(k_x, (N_ALL, C_IN), jnp.float32)
    n_id = jax.random.permutation(k_nid, N_ALL)[:N0]

    # adjs[i] carries (edge_index [src; dst], n_dst), matching PyG's
    # NeighborSampler (edge_index, e_id, size) for aggr='add'.
    e0 = jnp.stack([jax.random.randint(k_e0s, (E0,), 0, N0),
                    jax.random.randint(k_e0d, (E0,), 0, N1)])
    e1 = jnp.stack([jax.random.randint(k_e1s, (E1,), 0, N1),
                    jax.random.randint(k_e1d, (E1,), 0, N2)])
    adjs = [(e0, N1), (e1, N2)]

    # dst_tile=8 so layer 0 exercises a multi-tile ("parallel") grid.
    out = jax.block_until_ready(gnn_forward(params, x_all, n_id, adjs, dst_tile=8))
    ref = jax.block_until_ready(gnn_reference(params, x_all, n_id, adjs))

    assert out.shape == (N2, C_OUT), out.shape
    # log_softmax rows must sum (in prob space) to 1
    assert bool(jnp.all(jnp.abs(jnp.sum(jnp.exp(out), axis=-1) - 1.0) < 1e-4))
    # agree with the pure-JAX f32 reference (tolerance reflects bf16 MXU
    # operands with f32 accumulation vs the f32 XLA reference)
    assert bool(jnp.allclose(out, ref, atol=5e-2, rtol=5e-2)), \
        float(jnp.max(jnp.abs(out - ref)))
    print("KERNEL_OK")
</pallas_src>

<mosaic_0001>
module attributes {stable_mosaic.version = 11 : i64} {
  func.func @kernel(%arg0: i32, %arg1: memref<48xi32, #tpu.memory_space<smem>>, %arg2: memref<48xi32, #tpu.memory_space<smem>>, %arg3: memref<3xi32, #tpu.memory_space<smem>>, %arg4: memref<16x16xf32, #tpu.memory_space<vmem>>, %arg5: memref<16x32xbf16, #tpu.memory_space<vmem>>, %arg6: memref<1x32xf32, #tpu.memory_space<vmem>>, %arg7: memref<16x32xbf16, #tpu.memory_space<vmem>>, %arg8: memref<8x32xf32, #tpu.memory_space<vmem>>, %arg9: memref<8x16xf32, #tpu.memory_space<vmem>>) attributes {dimension_semantics = [#tpu.dimension_semantics<parallel>], iteration_bounds = array<i64: 2>, scalar_prefetch = 3 : i64, scratch_operands = 1 : i64, tpu.core_type = #tpu.core_type<tc>, window_params = [{pipeline_mode = #tpu.pipeline_mode<synchronous>, transform_indices = @transform_0, window_bounds = array<i64: 16, 16>}, {pipeline_mode = #tpu.pipeline_mode<synchronous>, transform_indices = @transform_1, window_bounds = array<i64: 16, 32>}, {pipeline_mode = #tpu.pipeline_mode<synchronous>, transform_indices = @transform_2, window_bounds = array<i64: 1, 32>}, {pipeline_mode = #tpu.pipeline_mode<synchronous>, transform_indices = @transform_3, window_bounds = array<i64: 16, 32>}, {transform_indices = @transform_4, window_bounds = array<i64: 8, 32>}]} {
    %c8_i32 = arith.constant 8 : i32
    %0 = arith.muli %arg0, %c8_i32 : i32
    %1 = tpu.assume_multiple %0, 8 : i32
    %cst = arith.constant 0.000000e+00 : f32
    %2 = vector.broadcast %cst : f32 to vector<8x16xf32>
    %c0 = arith.constant 0 : index
    %c0_0 = arith.constant 0 : index
    %3 = vector.load %arg9[%c0, %c0_0] : memref<8x16xf32, #tpu.memory_space<vmem>>, vector<8x16xf32>
    tpu.vector_store %arg9[%c0, %c0_0], %2 {strides = array<i32>} : memref<8x16xf32, #tpu.memory_space<vmem>>, vector<8x16xf32>,
    %4 = arith.index_cast %arg0 : i32 to index
    %5 = memref.load %arg3[%4] : memref<3xi32, #tpu.memory_space<smem>>
    %c1_i32 = arith.constant 1 : i32
    %6 = arith.addi %arg0, %c1_i32 : i32
    %7 = arith.index_cast %6 : i32 to index
    %8 = memref.load %arg3[%7] : memref<3xi32, #tpu.memory_space<smem>>
    %c0_i32 = arith.constant 0 : i32
    %9 = arith.subi %8, %5 : i32
    %10 = arith.addi %5, %9 : i32
    %c1_i32_1 = arith.constant 1 : i32
    scf.for %arg10 = %5 to %10 step %c1_i32_1  : i32 {
      %27 = arith.index_cast %arg10 : i32 to index
      %28 = memref.load %arg1[%27] : memref<48xi32, #tpu.memory_space<smem>>
      %29 = arith.index_cast %arg10 : i32 to index
      %30 = memref.load %arg2[%29] : memref<48xi32, #tpu.memory_space<smem>>
      %31 = arith.subi %30, %1 : i32
      %32 = arith.index_cast %28 : i32 to index
      %c0_16 = arith.constant 0 : index
      %33 = vector.load %arg4[%32, %c0_16] : memref<16x16xf32, #tpu.memory_space<vmem>>, vector<1x16xf32>
      %34 = arith.index_cast %31 : i32 to index
      %c0_17 = arith.constant 0 : index
      %35 = vector.load %arg9[%34, %c0_17] : memref<8x16xf32, #tpu.memory_space<vmem>>, vector<1x16xf32>
      %36 = arith.addf %35, %33 : vector<1x16xf32>
      %37 = arith.index_cast %31 : i32 to index
      %c0_18 = arith.constant 0 : index
      %38 = vector.load %arg9[%37, %c0_18] : memref<8x16xf32, #tpu.memory_space<vmem>>, vector<1x16xf32>
      tpu.vector_store %arg9[%37, %c0_18], %36 {strides = array<i32>} : memref<8x16xf32, #tpu.memory_space<vmem>>, vector<1x16xf32>,
    }
    %11 = arith.index_cast %1 : i32 to index
    %c0_2 = arith.constant 0 : index
    %12 = vector.load %arg4[%11, %c0_2] : memref<16x16xf32, #tpu.memory_space<vmem>>, vector<8x16xf32>
    %c0_3 = arith.constant 0 : index
    %c0_4 = arith.constant 0 : index
    %13 = vector.load %arg9[%c0_3, %c0_4] : memref<8x16xf32, #tpu.memory_space<vmem>>, vector<8x16xf32>
    %14 = arith.truncf %13 : vector<8x16xf32> to vector<8x16xbf16>
    %c0_5 = arith.constant 0 : index
    %c0_6 = arith.constant 0 : index
    %15 = vector.load %arg5[%c0_5, %c0_6] : memref<16x32xbf16, #tpu.memory_space<vmem>>, vector<16x32xbf16>
    %cst_7 = arith.constant dense<0.000000e+00> : vector<8x32xf32>
    %16 = tpu.matmul %14, %15, %cst_7 {dimension_numbers = #tpu.dot_dimension_numbers<[1], [0], [0], [1], [0, 0, 1, 1], [], []>} : vector<8x16xbf16>, vector<16x32xbf16>, vector<8x32xf32> -> vector<8x32xf32>
    %17 = arith.truncf %12 : vector<8x16xf32> to vector<8x16xbf16>
    %c0_8 = arith.constant 0 : index
    %c0_9 = arith.constant 0 : index
    %18 = vector.load %arg7[%c0_8, %c0_9] : memref<16x32xbf16, #tpu.memory_space<vmem>>, vector<16x32xbf16>
    %cst_10 = arith.constant dense<0.000000e+00> : vector<8x32xf32>
    %19 = tpu.matmul %17, %18, %cst_10 {dimension_numbers = #tpu.dot_dimension_numbers<[1], [0], [0], [1], [0, 0, 1, 1], [], []>} : vector<8x16xbf16>, vector<16x32xbf16>, vector<8x32xf32> -> vector<8x32xf32>
    %20 = arith.addf %16, %19 : vector<8x32xf32>
    %c0_11 = arith.constant 0 : index
    %c0_12 = arith.constant 0 : index
    %21 = vector.load %arg6[%c0_11, %c0_12] : memref<1x32xf32, #tpu.memory_space<vmem>>, vector<1x32xf32>
    %22 = vector.broadcast %21 : vector<1x32xf32> to vector<8x32xf32>
    %23 = arith.addf %20, %22 : vector<8x32xf32>
    %cst_13 = arith.constant 0.000000e+00 : f32
    %24 = vector.broadcast %cst_13 : f32 to vector<8x32xf32>
    %25 = arith.maximumf %23, %24 : vector<8x32xf32>
    %c0_14 = arith.constant 0 : index
    %c0_15 = arith.constant 0 : index
    %26 = vector.load %arg8[%c0_14, %c0_15] : memref<8x32xf32, #tpu.memory_space<vmem>>, vector<8x32xf32>
    tpu.vector_store %arg8[%c0_14, %c0_15], %25 {strides = array<i32>} : memref<8x32xf32, #tpu.memory_space<vmem>>, vector<8x32xf32>,
    return
  }
  func.func @transform_0(%arg0: i32, %arg1: memref<48xi32, #tpu.memory_space<smem>>, %arg2: memref<48xi32, #tpu.memory_space<smem>>, %arg3: memref<3xi32, #tpu.memory_space<smem>>) -> (i32, i32) {
    %c0_i32 = arith.constant 0 : i32
    %c0_i32_0 = arith.constant 0 : i32
    %c0_i32_1 = arith.constant 0 : i32
    return %c0_i32, %c0_i32_0 : i32, i32
  }
  func.func @transform_1(%arg0: i32, %arg1: memref<48xi32, #tpu.memory_space<smem>>, %arg2: memref<48xi32, #tpu.memory_space<smem>>, %arg3: memref<3xi32, #tpu.memory_space<smem>>) -> (i32, i32) {
    %c0_i32 = arith.constant 0 : i32
    %c0_i32_0 = arith.constant 0 : i32
    %c0_i32_1 = arith.constant 0 : i32
    return %c0_i32, %c0_i32_0 : i32, i32
  }
  func.func @transform_2(%arg0: i32, %arg1: memref<48xi32, #tpu.memory_space<smem>>, %arg2: memref<48xi32, #tpu.memory_space<smem>>, %arg3: memref<3xi32, #tpu.memory_space<smem>>) -> (i32, i32) {
    %c0_i32 = arith.constant 0 : i32
    %c0_i32_0 = arith.constant 0 : i32
    %c0_i32_1 = arith.constant 0 : i32
    return %c0_i32, %c0_i32_0 : i32, i32
  }
  func.func @transform_3(%arg0: i32, %arg1: memref<48xi32, #tpu.memory_space<smem>>, %arg2: memref<48xi32, #tpu.memory_space<smem>>, %arg3: memref<3xi32, #tpu.memory_space<smem>>) -> (i32, i32) {
    %c0_i32 = arith.constant 0 : i32
    %c0_i32_0 = arith.constant 0 : i32
    %c0_i32_1 = arith.constant 0 : i32
    return %c0_i32, %c0_i32_0 : i32, i32
  }
  func.func @transform_4(%arg0: i32, %arg1: memref<48xi32, #tpu.memory_space<smem>>, %arg2: memref<48xi32, #tpu.memory_space<smem>>, %arg3: memref<3xi32, #tpu.memory_space<smem>>) -> (i32, i32) {
    %c0_i32 = arith.constant 0 : i32
    %c0_i32_0 = arith.constant 0 : i32
    return %arg0, %c0_i32 : i32, i32
  }
}

</mosaic_0001>

<bundles_post_ra>
// kernel: tpu_custom_call.1
= control target key start
LH: loop header
LB: loop body
LE: loop exit
PB: predicated region body
PF: predicated region fallthrough
CT: control target
= control target key end

     0   :  { %s756_s30 = smov [#allocation4]   ;;  %s757_s8 = smov [#allocation5]   ;;  %s958_s0 = inlined_call_operand.hbm [shape: s32[48], index: 0, kind: input, shape index: {}]   ;;  %s959_s3 = inlined_call_operand.hbm [shape: f32[16,16], index: 3, kind: input, shape index: {}]   ;;  %s960_s4 = inlined_call_operand.hbm [shape: bf16[16,32], index: 4, kind: input, shape index: {}]   ;;  %s961_s5 = inlined_call_operand.vmem [shape: f32[1,32], index: 5, kind: input, shape index: {}]   ;;  %s962_s6 = inlined_call_operand.hbm [shape: bf16[16,32], index: 6, kind: input, shape index: {}]   ;;  %s963_s7 = inlined_call_operand.hbm [shape: f32[16,32], index: 7, kind: output, shape index: {}]   ;;  %s964_s1 = inlined_call_operand.hbm [shape: s32[48], index: 1, kind: input, shape index: {}]   ;;  %s965_s2 = inlined_call_operand.vmem [shape: s32[3], index: 2, kind: input, shape index: {}]  }
   0x1   :  { %s13_s26 = sshll.u32 %s958_s0, 4  ;;  %s18_s29 = sshll.u32 %s964_s1, 4  ;;  %s14_s26 = int_to_ptr.hbm [resolvable:$true] %s13_s26  ;;  %s19_s29 = int_to_ptr.hbm [resolvable:$true] %s18_s29 }
   0x2   :  { %16 = dma.hbm_to_smem %s14_s26, 16, %s756_s30, [#allocation3] }
   0x3   :  { %21 = dma.hbm_to_smem %s19_s29, 16, %s757_s8, [#allocation3] }
   0x4   :  { %s23_s11 = sshll.u32 %s965_s2, 4  ;;  %s758_s12 = smov [#allocation6]   ;;  %s24_s11 = int_to_ptr.vmem [resolvable:$true] %s23_s11 }
   0x5   :  { %26 = dma.vmem_to_smem %s24_s11, 16, %s758_s12, [#allocation3] }
   0x6   :  { %722 = dma.done.wait [#allocation3], 48 }
   0x7   :  { %723 = vsyncadd [#allocation3], 4294967248 }
   0x8   :  { %29 = sfence }
   0x9   :  { %30 = vsyncpa [#allocation8], 0 }
   0xa   :  { %31 = vsyncpa [#allocation11], 0 }
   0xb   :  { %32 = vsyncpa [#allocation9], 0 }
   0xc   :  { %34 = vsyncpa [#allocation9 + $0x1], 0  ;;  %s816_s0 = smov 0   ;;  %s818_s1 = smov 0  }
   0xd   :  { %s820_s13 = smov 0   ;;  %s822_s14 = smov 0  }
   0xe LB: > { %s837_s2 = sadd.s32 4294967295, %s750_s14   ;;  %s434_s15 = sadd.s32 4294967294, %s750_s14   ;;  %s750_s14 = sphi %s822_s14, %s973_s14   ;;  %s746_s13 = sphi %s820_s13, %s972_s13   ;;  %s742_s1 = sphi %s818_s1, %s971_s1   ;;  %s738_s0 = sphi %s816_s0, %s970_s0  }
   0xf   : > { %s841_s16 = sadd.s32 1, %s750_s14   ;;  %s131_s17 = sadd.s32 1, %s746_s13 }
  0x10   : > { %s128_s18 = ssub.s32 %s750_s14, %s841_s16  ;;  %p141_p0 = scmp.ne.s32.totalorder %s746_s13, %s742_s1 }
  0x11   : > { %p129_p1 = scmp.eq.s32.totalorder %s128_s18, 0  ;;  %p142_p2 = scmp.eq.s32.totalorder %s837_s2, 1 }
  0x12   : > { %p147_p3 = scmp.ne.s32.totalorder %s742_s1, %s738_s0  ;;  %p148_p4 = scmp.eq.s32.totalorder %s434_s15, 1 }
  0x13   : > { %s852_s19 = scalar_select %p129_p1, %s746_s13, %s131_s17  }
  0x14   : > { %p854_p5 = por %p142_p2, %p141_p0  ;;  %p858_p6 = por %p148_p4, %p147_p3 }
  0x15   : > { %p435_p7 = scmp.ge.s32.totalorder %s750_s14, 1  ;;  %p155_p8 = scmp.lt.s32.totalorder %s750_s14, 3 }
  0x16   : > { %p489_p9 = scmp.eq.s32.totalorder %s837_s2, 0  ;;  %s180_s25 = sshll.u32 %s960_s4, 4  ;;  %s181_s25 = int_to_ptr.hbm [resolvable:$true] %s180_s25 }
  0x17   : > { %p865_p10 = pnand %p435_p7, %p155_p8  ;;  %s759_s26 = smov [#allocation10]  }
  0x18   : > { %s182_s27 = sshll.u32 %s759_s26, 4  ;;  %s166_s8 = sshll.u32 %s959_s3, 4  ;;  %s183_s27 = int_to_ptr.vmem [resolvable:$true] %s182_s27  ;;  %s167_s8 = int_to_ptr.hbm [resolvable:$true] %s166_s8 }
  0x19   : > { %p475_p11 = pneg %p865_p10  ;;  %s760_s9 = smov 64  }
  0x1a   : > { %s761_s10 = smov 4   ;;  %s762_s11 = smov [#allocation7]  }
  0x1b   : > { %p876_p12 = pnand %p489_p9, %p475_p11  ;;  %s168_s12 = sshll.u32 %s762_s11, 4  ;;  %s169_s12 = int_to_ptr.vmem [resolvable:$true] %s168_s12 }
  0x1c   : > { %s763_s15 = smov 128   ;;  %s764_s17 = smov 8  }
  0x1d   : > { %481 = dma.hbm_to_vmem [thread:$0]  (!%p876_p12), %s181_s25, 128, %s183_s27, [#allocation11], %s760_s9, %s760_s9, %s761_s10  }
  0x1e   : > { %478 = dma.hbm_to_vmem [thread:$0]  (!%p876_p12), %s167_s8, 256, %s169_s12, [#allocation8], %s763_s15, %s763_s15, %s764_s17  }
  0x1f   : > { %s197_s24 = sshll.u32 %s962_s6, 4  ;;  %s765_s26 = smov [#allocation12]   ;;  %s198_s24 = int_to_ptr.hbm [resolvable:$true] %s197_s24 }
  0x20   : > { %s199_s29 = sshll.u32 %s765_s26, 4  ;;  %215 = sbr.rel (%p865_p10) target bundleno = 213 (0xd5), region = 36  ;;  %s200_s29 = int_to_ptr.vmem [resolvable:$true] %s199_s29 }
  0x21   : > { %484 = dma.hbm_to_vmem [thread:$0]  (!%p876_p12), %s198_s24, 128, %s200_s29, [#allocation11], %s760_s9, %s760_s9, %s761_s10  }
  0x25   : > { %725 = dma.done.wait (%p489_p9), [#allocation8], 256  }
  0x26   : > { %727 = vsyncadd (%p489_p9), [#allocation8], 4294967040 }
  0x27   : > { %729 = dma.done.wait (%p489_p9), [#allocation11], 256  }
  0x28   : > { %731 = vsyncadd (%p489_p9), [#allocation11], 4294967040  ;;  %s252_s25 = sadd.s32 1, %s837_s2  ;;  %s244_s22 = sand.u32 1, %s742_s1   ;;  %vm249_vm0 = vcmask 130048   ;;  %v766_v0 = vmov 0.0  }
  0x29   : > { %s251_s27 = sld [smem:[#allocation6 + %s837_s2]]   ;;  %s907_s28 = sshll.u32 %s244_s22, 3  ;;  %250 = vst.msk [vmem:[#allocation2] sm:$0xff] %vm249_vm0, %v766_v0 }
  0x2a   : > { %s253_s30 = sld [smem:[#allocation6 + %s252_s25]]  ;;  %s911_s8 = sshll.u32 %s837_s2, 3 }
  0x2b   : > { %s246_s9 = scalar_lea.vmem [#allocation13], %s907_s28 }
  0x30   : > { %p388_p13 = scmp.ge.s32.totalorder %s251_s27, %s253_s30 }
  0x31   : > { %s752_s10 = smov (!%p388_p13), %s251_s27  }
  0x32   : > { %389 = sbr.rel (%p388_p13) target bundleno = 68 (0x44), region = 85 }
  0x37 LB: >> { %s260_s11 = sld [smem:[#allocation4 + %s754_s10]]  ;;  %vm268_vm1 = vcmask 122880   ;;  %s754_s10 = sphi %s752_s10, %s257_s10  }
  0x38   : >> { %s261_s12 = sld [smem:[#allocation5 + %s754_s10]]  ;;  %s257_s10 = sadd.s32 1, %s754_s10  }
  0x39   : >> { %p256_p0 = scmp.ge.s32.totalorder %s257_s10, %s253_s30 }
  0x3d   : >> { %s263_s17 = scalar_lea.vmem [#allocation7], %s260_s11 }
  0x3e   : >> { %s262_s15 = ssub.s32 %s261_s12, %s911_s8  ;;  %v264_v1 = vld [vmem:[%s263_s17] sm:$0x1] }
  0x3f   : >> { %s265_s18 = scalar_lea.vmem [#allocation2], %s262_s15  ;;  %259 = sbr.rel (!%p256_p0) target bundleno = 55 (0x37), region = 91 }
  0x40   : >> { %v266_v2 = vld [vmem:[%s265_s18] sm:$0x1] }
  0x41   : >> { %v267_v3 = vadd.f32 %v266_v2, %v264_v1 }
  0x43   : >> { %269 = vst.msk [vmem:[%s265_s18] sm:$0x1] %vm268_vm1, %v267_v3 }
  0x44 PF: > { %v460_v4 = vld [vmem:[#allocation12] sm:$0xff]  ;;  %v459_v5 = vld [vmem:[#allocation10] sm:$0xff]  ;;  %s270_s2 = scalar_lea.vmem [#allocation7], %s911_s8  ;;  %s342_s25 = scalar_lea.hbm %s963_s7, %s911_s8  ;;  %vm329_vm2 = vcmask 261120  }
  0x45   : > { %v271_v7 = vld [vmem:[%s270_s2] sm:$0xff]  ;;  %295 = vmatpush.bf16.msra.mxu0 %v460_v4  ;;  %317 = vmatpush.bf16.msra.mxu1 %v459_v5  ;;  %s344_s27 = sshll.u32 %s246_s9, 4  ;;  %s346_s30 = sshll.u32 %s342_s25, 4  ;;  %s345_s27 = int_to_ptr.vmem [resolvable:$true] %s344_s27  ;;  %s347_s30 = int_to_ptr.hbm [resolvable:$true] %s346_s30 }
  0x46   : > { %v276_v9 = vpack.c.bf16 %v271_v7, %v271_v7  ;;  %v547_v10 = vld [vmem:[%s961_s5] ss:$0 sm:$0xff]  ;;  %s332_s10 = scalar_lea.sflag [#allocation9], %s244_s22  ;;  %s688_s11 = sshra.s32 %s347_s30, 4  ;;  %s689_s11 = int_to_ptr.hbm [resolvable:$true] %s688_s11 }
  0x47   : > { %s690_s8 = scalar_lea.hbm %s689_s11, 8  ;;  %s694_s17 = scalar_lea.hbm %s963_s7, 16 }
  0x48   : > { %449 = vmatmul.msk.bf16.vlgmr.msra.gmra.mxu0 %vm249_vm0, %v276_v9  ;;  %p691_p1 = scmp.ne.s32.totalorder %s689_s11, %s690_s8  ;;  %p695_p4 = scmp.lt.s32.totalorder %s689_s11, %s963_s7 }
  0x49   : > { %p696_p7 = scmp.lt.s32.totalorder %s694_s17, %s690_s8 }
  0x4a   : > { %v272_v6 = vld [vmem:[#allocation2] sm:$0xff]  ;;  %p692_p2 = pnand %p691_p1, %p854_p5 }
  0x4b   : > { %v273_v8 = vpack.c.bf16 %v272_v6, %v272_v6  ;;  %p697_p8 = por %p696_p7, %p695_p4 }
  0x4c   : > { %p693_p3 = pneg %p692_p2 }
  0x4d   : > { %454 = vmatmul.msk.bf16.vlgmr.msra.gmra.mxu1 %vm249_vm0, %v273_v8 }
  0x4e   : > { %p698_p9 = pnand %p697_p8, %p693_p3 }
  0xc5   : > { %v297_v11 = vpop.f32.mrf.mxu0 }
  0xca   : > { %v319_v12 = vpop.f32.mrf.mxu1 }
  0xcb   : > { %v320_v13 = vadd.f32 %v319_v12, %v297_v11 }
  0xcd   : > { %v327_v14 = vadd.f32 %v547_v10, %v320_v13  ;;  %v299_v16 = vpop.f32.mrf.mxu0 }
  0xcf   : > { %v328_v15 = vmax.f32 %v327_v14, 0.0 }
  0xd1   : > { %330 = vst.msk [vmem:[%s246_s9] sm:$0xff] %vm329_vm2, %v328_v15 }
  0xd2   : > { %v321_v17 = vpop.f32.mrf.mxu1 }
  0xd3   : > { %701 = shalt.err (!%p698_p9)
}
  0xd4   : > { %473 = dma.vmem_to_hbm [thread:$0]  (%p854_p5), %s345_s27, 128, %s347_s30, %s332_s10  }
  0xd5 PF: > { %p495_p10 = scmp.ge.s32.totalorder %s750_s14, 2  ;;  %s358_s22 = sand.u32 1, %s738_s0  }
  0xd6   : > { %s359_s28 = scalar_lea.sflag [#allocation9], %s358_s22 }
  0xd7   : > { %p486_p11 = pnand %p495_p10, %p858_p6 }
  0xd9   : > { %p487_p12 = pneg %p486_p11 }
  0xdb   : > { %733 = dma.done.wait (%p487_p12), %s359_s28, 128  }
  0xdc   : > { %735 = vsyncadd (%p487_p12), %s359_s28, 4294967168  ;;  %p37_p13 = scmp.ge.s32.totalorder %s841_s16, 4   ;;  %s970_s0 = smov %s742_s1 }
  0xdd   : > { %s971_s1 = smov %s746_s13  ;;  %s972_s13 = smov %s852_s19 }
  0xde   : > { %s973_s14 = smov %s841_s16  ;;  %39 = sbr.rel (!%p37_p13) target bundleno = 14 (0xe), region = 102 }
  0xe3   :  { %365 = vsyncpa [#allocation8], 1 }
  0xe4   :  { %367 = vsyncpa [#allocation8 + $0x1], 1 }
  0xe5   :  { %368 = vsyncpa [#allocation11], 1 }
  0xe6   :  { %369 = vsyncpa [#allocation9], 1 }
  0xe7   :  { %371 = vsyncpa [#allocation9 + $0x1], 1 }

</bundles_post_ra>
